<compile_context>
chip_gen: v6e
topology: v6e:2x2x1
jax: 0.10.0
libtpu: 0.0.40
codegen_flags: <defaults>
</compile_context>

<pallas_src>
import functools
import math

import jax
import jax.numpy as jnp
from jax.experimental import pallas as pl
from jax.experimental.pallas import tpu as pltpu


def make_sinusoidal_pe(max_len: int, d_model: int) -> jnp.ndarray:
    """Build the (max_len, d_model) sinusoidal table exactly like the PyTorch __init__."""
    position = jnp.arange(0, max_len, dtype=jnp.float32)[:, None]              # (L, 1)
    div_term = jnp.exp(jnp.arange(0, d_model, 2, dtype=jnp.float32)
                       * (-math.log(10000.0) / d_model))                        # (D/2,)
    angles = position * div_term                                                # (L, D/2)
    pe = jnp.zeros((max_len, d_model), dtype=jnp.float32)
    pe = pe.at[:, 0::2].set(jnp.sin(angles))
    pe = pe.at[:, 1::2].set(jnp.cos(angles))
    return pe


# ----------------------------- kernels ------------------------------------- #

def _pe_kernel_eval(x_ref, pe_ref, o_ref):
    # x_ref: (TB, TL)  pe_ref: (1, TL)  o_ref: (TB, TL)
    o_ref[...] = (x_ref[...] + pe_ref[...]).astype(o_ref.dtype)


def _pe_kernel_train(x_ref, pe_ref, bits_ref, o_ref, *, threshold: int, scale: float):
    # Inverted dropout, keep-test done in integer domain (no float cast of the bits).
    y = x_ref[...] + pe_ref[...]
    keep = bits_ref[...] >= jnp.uint32(threshold)
    o_ref[...] = jnp.where(keep, y * scale, jnp.zeros_like(y)).astype(o_ref.dtype)


# ----------------------------- wrapper -------------------------------------- #

def _pick_lane_tile(L: int, max_elems: int) -> int:
    """Largest multiple-of-128 divisor of L that is <= max_elems (else full L)."""
    if L <= max_elems or L % 128 != 0:
        return L
    cap = max(128, (max_elems // 128) * 128)
    for t in range(cap, 127, -128):
        if L % t == 0:
            return t
    return L


def positional_encoding(x, pe_full, *, p: float = 0.1, training: bool = False,
                        rng_key=None):
    """x: (B, S, D); pe_full: (max_len, D). Returns dropout(x + pe[:S]) like the module."""
    B, S, D = x.shape
    L = S * D
    itemsize = jnp.dtype(x.dtype).itemsize

    # Lane-dense layout: flatten (S, D) into one long last axis.
    x_flat = x.reshape(B, L)
    pe = pe_full[:S, :].astype(x.dtype).reshape(1, L)   # tiny constant slab

    # Tile sizes: batch tile (sublane axis) and lane tile, ~2 MiB per buffer tile
    # so 2x double-buffered x/out/(bits) + pe stays well under scoped VMEM on all gens.
    TB = B if B <= 8 else 8
    TL = _pick_lane_tile(L, max_elems=max(128, (2 * 1024 * 1024) // (TB * itemsize)))
    grid = (pl.cdiv(B, TB), pl.cdiv(L, TL))

    x_spec = pl.BlockSpec((TB, TL), lambda i, j: (i, j))
    pe_spec = pl.BlockSpec((1, TL), lambda i, j: (0, j))
    out_spec = pl.BlockSpec((TB, TL), lambda i, j: (i, j))

    use_dropout = training and p > 0.0
    if use_dropout:
        if rng_key is None:
            rng_key = jax.random.PRNGKey(0)
        bits = jax.random.bits(rng_key, (B, L), dtype=jnp.uint32)
        threshold = min(int(p * (2 ** 32)), 2 ** 32 - 1)
        kernel = functools.partial(_pe_kernel_train, threshold=threshold,
                                   scale=1.0 / (1.0 - p))
        in_specs = [x_spec, pe_spec, pl.BlockSpec((TB, TL), lambda i, j: (i, j))]
        args = (x_flat, pe, bits)
        bits_bytes = B * L * 4
    else:
        kernel = _pe_kernel_eval
        in_specs = [x_spec, pe_spec]
        args = (x_flat, pe)
        bits_bytes = 0

    bytes_accessed = 2 * B * L * itemsize + L * itemsize + bits_bytes

    out_flat = pl.pallas_call(
        kernel,
        out_shape=jax.ShapeDtypeStruct((B, L), x.dtype),
        grid_spec=pltpu.PrefetchScalarGridSpec(
            num_scalar_prefetch=0,
            grid=grid,
            in_specs=in_specs,
            out_specs=out_spec,
        ),
        compiler_params=pltpu.CompilerParams(
            dimension_semantics=("parallel", "parallel"),
            vmem_limit_bytes=32 * 1024 * 1024,
        ),
        cost_estimate=pl.CostEstimate(
            flops=B * L, transcendentals=0, bytes_accessed=bytes_accessed),
    )(*args)

    return out_flat.reshape(B, S, D)


# ----------------------------- demo / check --------------------------------- #

if __name__ == "__main__":
    d_model = 32
    max_len = 100
    batch, seq = 2, 8
    p = 0.1

    key = jax.random.PRNGKey(0)
    x = jax.random.normal(key, (batch, seq, d_model), dtype=jnp.float32)

    pe_full = make_sinusoidal_pe(max_len, d_model)

    # Eval-mode forward (dropout is identity), matching module.eval() semantics.
    out = positional_encoding(x, pe_full, p=p, training=False)
    out = jax.block_until_ready(out)

    ref = x + pe_full[None, :seq, :]
    assert out.shape == (batch, seq, d_model)
    assert jnp.allclose(out, ref, atol=1e-6), "mismatch vs reference (eval)"

    # Training-mode forward: inverted dropout with host-supplied random bits.
    drop_key = jax.random.PRNGKey(123)
    out_train = jax.block_until_ready(
        positional_encoding(x, pe_full, p=p, training=True, rng_key=drop_key))
    assert out_train.shape == (batch, seq, d_model)
    expected_kept = ref / (1.0 - p)
    ok = jnp.logical_or(out_train == 0.0,
                        jnp.isclose(out_train, expected_kept, atol=1e-5))
    assert bool(jnp.all(ok)), "training output not {0, (x+pe)/(1-p)} elementwise"

    print("KERNEL_OK")
</pallas_src>

<mosaic_0001>
module attributes {stable_mosaic.version = 11 : i64} {
  func.func @_pe_kernel_eval(%arg0: i32, %arg1: i32, %arg2: memref<2x256xf32, #tpu.memory_space<vmem>>, %arg3: memref<1x256xf32, #tpu.memory_space<vmem>>, %arg4: memref<2x256xf32, #tpu.memory_space<vmem>>) attributes {dimension_semantics = [#tpu.dimension_semantics<parallel>, #tpu.dimension_semantics<parallel>], iteration_bounds = array<i64: 1, 1>, scalar_prefetch = 0 : i64, scratch_operands = 0 : i64, tpu.core_type = #tpu.core_type<tc>, window_params = [{transform_indices = @transform_0, window_bounds = array<i64: 2, 256>}, {transform_indices = @transform_1, window_bounds = array<i64: 1, 256>}, {transform_indices = @transform_2, window_bounds = array<i64: 2, 256>}]} {
    %c0 = arith.constant 0 : index
    %c0_0 = arith.constant 0 : index
    %0 = vector.load %arg2[%c0, %c0_0] : memref<2x256xf32, #tpu.memory_space<vmem>>, vector<2x256xf32>
    %c0_1 = arith.constant 0 : index
    %c0_2 = arith.constant 0 : index
    %1 = vector.load %arg3[%c0_1, %c0_2] : memref<1x256xf32, #tpu.memory_space<vmem>>, vector<1x256xf32>
    %2 = vector.broadcast %1 : vector<1x256xf32> to vector<2x256xf32>
    %3 = arith.addf %0, %2 : vector<2x256xf32>
    %c0_3 = arith.constant 0 : index
    %c0_4 = arith.constant 0 : index
    %4 = vector.load %arg4[%c0_3, %c0_4] : memref<2x256xf32, #tpu.memory_space<vmem>>, vector<2x256xf32>
    tpu.vector_store %arg4[%c0_3, %c0_4], %3 {strides = array<i32>} : memref<2x256xf32, #tpu.memory_space<vmem>>, vector<2x256xf32>,
    return
  }
  func.func @transform_0(%arg0: i32, %arg1: i32) -> (i32, i32) {
    %c0_i32 = arith.constant 0 : i32
    return %arg0, %arg1 : i32, i32
  }
  func.func @transform_1(%arg0: i32, %arg1: i32) -> (i32, i32) {
    %c0_i32 = arith.constant 0 : i32
    %c0_i32_0 = arith.constant 0 : i32
    return %c0_i32, %arg1 : i32, i32
  }
  func.func @transform_2(%arg0: i32, %arg1: i32) -> (i32, i32) {
    %c0_i32 = arith.constant 0 : i32
    return %arg0, %arg1 : i32, i32
  }
}

</mosaic_0001>

<bundles_post_ra>
// kernel: tpu_custom_call.1
= control target key start
LH: loop header
LB: loop body
LE: loop exit
PB: predicated region body
PF: predicated region fallthrough
CT: control target
= control target key end

     0   :  { %7 = vsyncpa [#allocation3], 0  ;;  %s172_s0 = inlined_call_operand.hbm [shape: f32[2,256], index: 0, kind: input, shape index: {}]   ;;  %s173_s1 = inlined_call_operand.hbm [shape: f32[1,256], index: 1, kind: input, shape index: {}]   ;;  %s174_s2 = inlined_call_operand.hbm [shape: f32[2,256], index: 2, kind: output, shape index: {}]  }
   0x1   :  { %8 = vsyncpa [#allocation6], 0 }
   0x2   :  { %9 = vsyncpa [#allocation4], 0  ;;  %s144_s9 = smov [#allocation2]   ;;  %s145_s11 = smov [#allocation5]  }
   0x3   :  { %s16_s10 = sshll.u32 %s144_s9, 4  ;;  %s26_s12 = sshll.u32 %s145_s11, 4  ;;  %s17_s10 = int_to_ptr.vmem [resolvable:$true] %s16_s10  ;;  %s27_s12 = int_to_ptr.vmem [resolvable:$true] %s26_s12 }
   0x4   :  { %s86_s13 = scalar_lea.vmem %s17_s10, 64  ;;  %p91_p1 = scmp.lt.s32.totalorder %s17_s10, %s17_s10 }
   0x5   :  { %p87_p0 = scmp.ne.s32.totalorder %s17_s10, %s86_s13  ;;  %p92_p2 = scmp.lt.s32.totalorder %s86_s13, %s86_s13 }
   0x7   :  { %p93_p3 = por %p92_p2, %p91_p1 }
   0x9   :  { %p94_p4 = pnand %p93_p3, %p87_p0 }
   0xb   :  { %97 = shalt.err (!%p94_p4)
}
   0xc   :  { %19 = dma.hbm_to_vmem [thread:$0]  %s172_s0, 64, %s17_s10, [#allocation3]  }
   0xd   :  { %s106_s16 = scalar_lea.vmem %s27_s12, 32  ;;  %p111_p6 = scmp.lt.s32.totalorder %s27_s12, %s27_s12 }
   0xe   :  { %p107_p5 = scmp.ne.s32.totalorder %s27_s12, %s106_s16  ;;  %p112_p7 = scmp.lt.s32.totalorder %s106_s16, %s106_s16 }
  0x10   :  { %p113_p8 = por %p112_p7, %p111_p6 }
  0x12   :  { %p114_p9 = pnand %p113_p8, %p107_p5 }
  0x14   :  { %117 = shalt.err (!%p114_p9)
}
  0x15   :  { %29 = dma.hbm_to_vmem [thread:$0]  %s173_s1, 32, %s27_s12, [#allocation6]  }
  0x16   :  { %138 = dma.done.wait [#allocation3], 64  }
  0x17   :  { %139 = vsyncadd [#allocation3], 4294967232 }
  0x18   :  { %140 = dma.done.wait [#allocation6], 32  }
  0x19   :  { %141 = vsyncadd [#allocation6], 4294967264  ;;  %v39_v0 = vlaneseq  ;;  %v146_v1 = vmov 1983009808   ;;  %v37_v7 = vld [vmem:[#allocation5] sm:$0x3] }
  0x1a   :  { %v49_v2 = vunpack.c.l.s4 %v146_v1  ;;  %v36_v12 = vld [vmem:[#allocation2] sm:$0xf]  ;;  %s147_s0 = smov [#allocation7]  }
  0x1b   :  { %v40_v3 = vshrl.u32 %v39_v0, 7  ;;  %s64_s19 = sshll.u32 %s147_s0, 4  ;;  %s65_s19 = int_to_ptr.vmem [resolvable:$true] %s64_s19 }
  0x1c   :  { %v50_v6 = vunpack.c.0.s8 %v49_v2  ;;  %s118_s1 = scalar_lea.vmem %s65_s19, 64  ;;  %p123_p11 = scmp.lt.s32.totalorder %s65_s19, %s65_s19 }
  0x1d   :  { %v41_v4 = vsub.s32 0, %v40_v3  ;;  %v45_v5 = vsub.s32 1, %v40_v3  ;;  %p119_p10 = scmp.ne.s32.totalorder %s65_s19, %s118_s1  ;;  %p124_p12 = scmp.lt.s32.totalorder %s118_s1, %s118_s1 }
  0x1e   :  { %v53_v10 = vsub.s32 %v50_v6, %v40_v3 }
  0x1f   :  { %v42_v8 = vrot.slane %v37_v7, %v41_v4  ;;  %v46_v9 = vrot.slane %v37_v7, %v45_v5  ;;  %p125_p13 = por %p124_p12, %p123_p11 }
  0x21   :  { %v47_v11 = vcombine.low %v42_v8, %v46_v9  ;;  %p126_p0 = pnand %p125_p13, %p119_p10 }
  0x23   :  { %v54_v13 = vrot.slane %v47_v11, %v53_v10 }
  0x25   :  { %v56_v14 = vadd.f32 %v54_v13, %v36_v12 }
  0x27   :  { %57 = vst [vmem:[#allocation7] sm:$0xf] %v56_v14 }
  0x28   :  { %129 = shalt.err (!%p126_p0)
}
  0x29   :  { %67 = dma.vmem_to_hbm [thread:$0]  %s65_s19, 64, %s174_s2, [#allocation4]  }
  0x2a   :  { %142 = dma.done.wait [#allocation4], 64  }
  0x2b   :  { %143 = vsyncadd [#allocation4], 4294967232 }
  0x2c   :  { %71 = vsyncpa [#allocation3], 1 }
  0x2d   :  { %72 = vsyncpa [#allocation6], 1 }
  0x2e   :  { %73 = vsyncpa [#allocation4], 1 }

</bundles_post_ra>
